<compile_context>
chip_gen: v5e
topology: v5e:2x2
jax: 0.10.0
libtpu: 0.0.40
codegen_flags: <defaults>
</compile_context>

<pallas_src>
import jax
import jax.numpy as jnp
from jax.experimental import pallas as pl
from jax.experimental.pallas import tpu as pltpu

# ---- model hyper-parameters (args) ------------------------------------------
OBS_LENGTH = 4
SEQ_LEN = 8                    # T: total trajectory length (obs + pred)
BATCH = 8                      # N: number of agents (PyTorch LSTM "batch" dim)
FEATS_IN = 4
FEATS_HIDDEN = 32              # H
FEATS_OUT = 2                  # traj differenced against the (x, y) target
K = 20                         # hard-coded repeat(1, 1, 20, 1) in the reference
PRED_LEN = SEQ_LEN - OBS_LENGTH

T, N, H, P = SEQ_LEN, BATCH, FEATS_HIDDEN, PRED_LEN
G = 4 * H                      # 128 gate lanes (i | f | g | o) = one f32 vreg
F_PAD = 8                      # input features zero-padded 4 -> 8

# ---- packed-weight slab layout (rows x 128 lanes, f32) -----------------------
_R_W1 = 0                      # rows [0, 8)    : w1 (F_PAD, H) in lanes [0, H)
_R_BIAS = 8                    # rows [8, 16)   : +0 b1[:H]; +1 b2l[:G]; +2 b34[:2]
_R_W2IH = 16                   # rows [16, 48)  : w2 @ wih   (H, G)
_R_WHH = 48                    # rows [48, 80)  : whh        (H, G)
_R_W34 = 80                    # rows [80, 112) : w3 @ w4    (H, 2) in lanes [0, 2)
SLAB_ROWS = 112


# ---- fully fused forward kernel (encoder + LSTM + decoder + loss) ------------
def _fused_forward_kernel(x_ref, w_ref, out_ref):
    # -- carve the packed weight slab (static slices of the single operand) ----
    w1 = w_ref[_R_W1:_R_W1 + F_PAD, 0:H]                    # (8, 32); rows >= FEATS_IN are 0
    bias = w_ref[_R_BIAS:_R_BIAS + 8, :]                    # (8, 128)
    b1 = bias[0:1, 0:H]                                     # (1, 32)
    b2l = bias[1:2, :]                                      # (1, 128) = b2 @ wih + b_lstm
    b34 = bias[2:3, 0:FEATS_OUT]                            # (1, 2)   = b3 @ w4 + b4
    w2ih = w_ref[_R_W2IH:_R_W2IH + H, :]                    # (32, 128) = w2 @ wih
    whh = w_ref[_R_WHH:_R_WHH + H, :]                       # (32, 128)
    w34 = w_ref[_R_W34:_R_W34 + H, 0:FEATS_OUT]             # (32, 2)  = w3 @ w4

    x = x_ref[...]                                          # (T*N, F_PAD)

    # -- encoder + hoisted input projection (runs ONCE, outside the recurrence)
    x_obs = x[0:OBS_LENGTH * N, :]                          # (32, 8)
    a = jnp.maximum(
        jnp.dot(x_obs, w1, preferred_element_type=jnp.float32) + b1, 0.0)
    gin_obs = jnp.dot(a, w2ih, preferred_element_type=jnp.float32) + b2l   # (32, 128)
    # zero-padded future inputs -> constant row relu(b1) @ w2ih + b2l
    gin_pad = jnp.dot(jnp.maximum(b1, 0.0), w2ih,
                      preferred_element_type=jnp.float32) + b2l            # (1, 128)
    gin_pad = jnp.broadcast_to(gin_pad, (N, G))             # hoisted out of the loop

    # -- LSTM recurrence, statically unrolled (PyTorch gate order: i, f, g, o) -
    h = jnp.zeros((N, H), jnp.float32)
    c = jnp.zeros((N, H), jnp.float32)
    h_pred = []
    for t in range(T):
        gin_t = gin_obs[t * N:(t + 1) * N, :] if t < OBS_LENGTH else gin_pad
        if t == 0:                                          # h == 0: skip the matmul
            gates = gin_t
        else:
            gates = gin_t + jnp.dot(h, whh, preferred_element_type=jnp.float32)
        # full-vreg transcendentals (one (8,128) sigmoid + one tanh on the EUP),
        # then static gate slices (compiler inserts the lane realignments).
        sig = jax.nn.sigmoid(gates)
        th = jnp.tanh(gates)
        i = sig[:, 0 * H:1 * H]
        f = sig[:, 1 * H:2 * H]
        g = th[:, 2 * H:3 * H]
        o = sig[:, 3 * H:4 * H]
        c = f * c + i * g
        h = o * jnp.tanh(c)
        if t >= OBS_LENGTH:
            h_pred.append(h)

    # -- folded decoder: pro4(pro3(hs)) == hs @ (w3 @ w4) + (b3 @ w4 + b4) -----
    hs = jnp.concatenate(h_pred, axis=0)                    # (P*N, 32)
    y = jnp.dot(hs, w34, preferred_element_type=jnp.float32) + b34          # (P*N, 2)

    # -- trajectory RMSE loss; the K identical copies collapse to sum(sqrt)/N --
    tgt = x[OBS_LENGTH * N:T * N, 0:FEATS_OUT]              # (P*N, 2)
    d = y - tgt
    r = jnp.sqrt(jnp.sum(d * d, axis=1, keepdims=True))     # (P*N, 1)
    loss = jnp.sum(r, axis=0, keepdims=True) * (1.0 / N)    # (1, 1)

    # -- single output slab: rows [0, P*N) trajectory, row P*N holds the loss --
    out_ref[0:P * N, :] = y
    out_ref[P * N:P * N + 8, :] = jnp.broadcast_to(loss, (8, FEATS_OUT))


# ---- host-side packing of all parameters into one lane-dense slab ------------
def pack_params(params):
    """Pre-fold linear chains and pack every weight/bias into a (112,128) slab."""
    w2ih = params["w2"] @ params["wih"]                     # pro2 folded into W_ih
    b2l = params["b2"] @ params["wih"] + params["bl"]
    w34 = params["w3"] @ params["w4"]                       # pro3 folded into pro4
    b34 = params["b3"] @ params["w4"] + params["b4"]
    slab = jnp.zeros((SLAB_ROWS, G), jnp.float32)
    slab = slab.at[_R_W1:_R_W1 + FEATS_IN, 0:H].set(params["w1"])
    slab = slab.at[_R_BIAS + 0, 0:H].set(params["b1"][0])
    slab = slab.at[_R_BIAS + 1, :].set(b2l[0])
    slab = slab.at[_R_BIAS + 2, 0:FEATS_OUT].set(b34[0])
    slab = slab.at[_R_W2IH:_R_W2IH + H, :].set(w2ih)
    slab = slab.at[_R_WHH:_R_WHH + H, :].set(params["whh"])
    slab = slab.at[_R_W34:_R_W34 + H, 0:FEATS_OUT].set(w34)
    return slab


def _run_fused_forward(x2d, slab):
    vmem = pl.BlockSpec(memory_space=pltpu.MemorySpace.VMEM)
    return pl.pallas_call(
        _fused_forward_kernel,
        out_shape=jax.ShapeDtypeStruct((P * N + 8, FEATS_OUT), jnp.float32),
        in_specs=[vmem, vmem],
        out_specs=vmem,
        cost_estimate=pl.CostEstimate(
            flops=800_000, transcendentals=25_000, bytes_accessed=61_000),
    )(x2d, slab)


@jax.jit
def _forward_impl(batch, slab):
    # (T, N, F) -> (T*N, F_PAD): contiguous reshape + zero lane-pad, XLA-fused.
    x2d = jnp.pad(batch.reshape(T * N, FEATS_IN),
                  ((0, 0), (0, F_PAD - FEATS_IN)))
    out = _run_fused_forward(x2d, slab)
    tra = out[:P * N].reshape(P, N, FEATS_OUT)              # (P, N, 2)
    loss_traj = out[P * N, 0]
    traj = jnp.transpose(tra, (1, 0, 2))[:, :, None, :]     # (N, P, 1, 2)
    traj = jnp.broadcast_to(traj, (N, P, K, FEATS_OUT))     # K identical copies
    return traj, loss_traj


# ---- forward (glue, matches the PyTorch module's return contract) ------------
def lstm_forward(batch, packed_params, iftrain=True):
    del iftrain                                             # unused, as in the reference
    assert batch.shape == (T, N, FEATS_IN)
    traj, loss_traj = _forward_impl(batch, packed_params)
    loss_dict = {"loss_flow": jnp.zeros((1,), jnp.int32), "loss_traj": loss_traj}
    return traj, loss_dict


# ---- deterministic parameter init (synthetic, PyTorch-like uniform) ----------
def init_params(key):
    Hh, Fo = FEATS_HIDDEN // 2, FEATS_OUT
    ks = jax.random.split(key, 12)

    def lin(kw, kb, fan_in, fan_out):
        bound = 1.0 / (fan_in ** 0.5)
        w = jax.random.uniform(kw, (fan_in, fan_out), jnp.float32, -bound, bound)
        b = jax.random.uniform(kb, (1, fan_out), jnp.float32, -bound, bound)
        return w, b

    w1, b1 = lin(ks[0], ks[1], FEATS_IN, H)
    w2, b2 = lin(ks[2], ks[3], H, H)
    w3, b3 = lin(ks[4], ks[5], H, Hh)
    w4, b4 = lin(ks[6], ks[7], Hh, Fo)
    bound = 1.0 / (H ** 0.5)
    wih = jax.random.uniform(ks[8], (H, 4 * H), jnp.float32, -bound, bound)
    whh = jax.random.uniform(ks[9], (H, 4 * H), jnp.float32, -bound, bound)
    bl = (jax.random.uniform(ks[10], (1, 4 * H), jnp.float32, -bound, bound)
          + jax.random.uniform(ks[11], (1, 4 * H), jnp.float32, -bound, bound))
    return dict(w1=w1, b1=b1, w2=w2, b2=b2, wih=wih, whh=whh, bl=bl,
                w3=w3, b3=b3, w4=w4, b4=b4)


# ---- pure-JAX reference for validation ---------------------------------------
def reference_forward(batch, params):
    obs = OBS_LENGTH
    Tt, Nn, _ = batch.shape
    batch_in = jnp.concatenate([batch[:obs], jnp.zeros_like(batch[obs:])], 0)
    e = jnp.maximum(batch_in @ params["w1"] + params["b1"][0], 0.0)
    e = e @ params["w2"] + params["b2"][0]

    def step(carry, x):
        h, c = carry
        gates = x @ params["wih"] + h @ params["whh"] + params["bl"][0]
        i = jax.nn.sigmoid(gates[:, :H])
        f = jax.nn.sigmoid(gates[:, H:2 * H])
        g = jnp.tanh(gates[:, 2 * H:3 * H])
        o = jax.nn.sigmoid(gates[:, 3 * H:4 * H])
        c = f * c + i * g
        h = o * jnp.tanh(c)
        return (h, c), h

    (_, _), hs = jax.lax.scan(
        step, (jnp.zeros((Nn, H), jnp.float32), jnp.zeros((Nn, H), jnp.float32)), e)
    y = hs @ params["w3"] + params["b3"][0]
    tra = y @ params["w4"] + params["b4"][0]
    traj = jnp.tile(jnp.transpose(tra[obs:], (1, 0, 2))[:, :, None, :], (1, 1, K, 1))
    tar_y = jnp.transpose(batch[obs:, :, :2], (1, 0, 2))
    tgt = jnp.tile(tar_y[:, :, None, :], (1, 1, K, 1))
    rmse = jnp.sqrt(jnp.sum((traj - tgt) ** 2, -1)).sum(1)
    return traj, rmse.mean()


if __name__ == "__main__":
    key = jax.random.PRNGKey(0)
    kb, kp = jax.random.split(key)
    params = init_params(kp)
    packed = pack_params(params)                             # built once, at "init"
    batch = jax.random.normal(kb, (SEQ_LEN, BATCH, FEATS_IN), dtype=jnp.float32)

    traj, loss_dict = lstm_forward(batch, packed, iftrain=True)
    jax.block_until_ready((traj, loss_dict))

    ref_traj, ref_loss = reference_forward(batch, params)
    assert traj.shape == (BATCH, SEQ_LEN - OBS_LENGTH, K, FEATS_OUT)
    assert jnp.allclose(traj, ref_traj, atol=1e-4, rtol=1e-4)
    assert jnp.allclose(loss_dict["loss_traj"], ref_loss, atol=1e-4, rtol=1e-4)

    print("KERNEL_OK")
</pallas_src>

<mosaic_0001>
module attributes {stable_mosaic.version = 11 : i64} {
  func.func @_fused_forward_kernel(%arg0: memref<64x8xf32, #tpu.memory_space<vmem>>, %arg1: memref<112x128xf32, #tpu.memory_space<vmem>>, %arg2: memref<40x2xf32, #tpu.memory_space<vmem>>) attributes {dimension_semantics = [], scalar_prefetch = 0 : i64, scratch_operands = 0 : i64, tpu.core_type = #tpu.core_type<tc>} {
    %c0 = arith.constant 0 : index
    %c0_0 = arith.constant 0 : index
    %0 = vector.load %arg1[%c0, %c0_0] : memref<112x128xf32, #tpu.memory_space<vmem>>, vector<8x32xf32>
    %c8 = arith.constant 8 : index
    %c0_1 = arith.constant 0 : index
    %1 = vector.load %arg1[%c8, %c0_1] : memref<112x128xf32, #tpu.memory_space<vmem>>, vector<8x128xf32>
    %2 = vector.extract_strided_slice %1 {offsets = [0, 0], sizes = [1, 32], strides = [1, 1]} : vector<8x128xf32> to vector<1x32xf32>
    %3 = vector.extract_strided_slice %1 {offsets = [1, 0], sizes = [1, 128], strides = [1, 1]} : vector<8x128xf32> to vector<1x128xf32>
    %4 = vector.extract_strided_slice %1 {offsets = [2, 0], sizes = [1, 2], strides = [1, 1]} : vector<8x128xf32> to vector<1x2xf32>
    %c16 = arith.constant 16 : index
    %c0_2 = arith.constant 0 : index
    %5 = vector.load %arg1[%c16, %c0_2] : memref<112x128xf32, #tpu.memory_space<vmem>>, vector<32x128xf32>
    %c48 = arith.constant 48 : index
    %c0_3 = arith.constant 0 : index
    %6 = vector.load %arg1[%c48, %c0_3] : memref<112x128xf32, #tpu.memory_space<vmem>>, vector<32x128xf32>
    %c80 = arith.constant 80 : index
    %c0_4 = arith.constant 0 : index
    %7 = vector.load %arg1[%c80, %c0_4] : memref<112x128xf32, #tpu.memory_space<vmem>>, vector<32x2xf32>
    %c0_5 = arith.constant 0 : index
    %c0_6 = arith.constant 0 : index
    %8 = vector.load %arg0[%c0_5, %c0_6] : memref<64x8xf32, #tpu.memory_space<vmem>>, vector<64x8xf32>
    %9 = vector.extract_strided_slice %8 {offsets = [0, 0], sizes = [32, 8], strides = [1, 1]} : vector<64x8xf32> to vector<32x8xf32>
    %cst = arith.constant dense<0.000000e+00> : vector<32x32xf32>
    %10 = tpu.matmul %9, %0, %cst {dimension_numbers = #tpu.dot_dimension_numbers<[1], [0], [0], [1], [0, 0, 1, 1], [], []>} : vector<32x8xf32>, vector<8x32xf32>, vector<32x32xf32> -> vector<32x32xf32>
    %11 = vector.broadcast %2 : vector<1x32xf32> to vector<32x32xf32>
    %12 = arith.addf %10, %11 : vector<32x32xf32>
    %cst_7 = arith.constant 0.000000e+00 : f32
    %13 = vector.broadcast %cst_7 : f32 to vector<32x32xf32>
    %14 = arith.maximumf %12, %13 : vector<32x32xf32>
    %cst_8 = arith.constant dense<0.000000e+00> : vector<32x128xf32>
    %15 = tpu.matmul %14, %5, %cst_8 {dimension_numbers = #tpu.dot_dimension_numbers<[1], [0], [0], [1], [0, 0, 1, 1], [], []>} : vector<32x32xf32>, vector<32x128xf32>, vector<32x128xf32> -> vector<32x128xf32>
    %16 = vector.broadcast %3 : vector<1x128xf32> to vector<32x128xf32>
    %17 = arith.addf %15, %16 : vector<32x128xf32>
    %cst_9 = arith.constant 0.000000e+00 : f32
    %18 = vector.broadcast %cst_9 : f32 to vector<1x32xf32>
    %19 = arith.maximumf %2, %18 : vector<1x32xf32>
    %cst_10 = arith.constant dense<0.000000e+00> : vector<1x128xf32>
    %20 = tpu.matmul %19, %5, %cst_10 {dimension_numbers = #tpu.dot_dimension_numbers<[1], [0], [0], [1], [0, 0, 1, 1], [], []>} : vector<1x32xf32>, vector<32x128xf32>, vector<1x128xf32> -> vector<1x128xf32>
    %21 = arith.addf %20, %3 : vector<1x128xf32>
    %22 = vector.shape_cast %21 : vector<1x128xf32> to vector<1x128xf32>
    %23 = vector.broadcast %22 : vector<1x128xf32> to vector<8x128xf32>
    %cst_11 = arith.constant 0.000000e+00 : f32
    %24 = vector.broadcast %cst_11 : f32 to vector<8x32xf32>
    %25 = vector.extract_strided_slice %17 {offsets = [0, 0], sizes = [8, 128], strides = [1, 1]} : vector<32x128xf32> to vector<8x128xf32>
    %26 = arith.negf %25 : vector<8x128xf32>
    %27 = math.exp %26 : vector<8x128xf32>
    %cst_12 = arith.constant 1.000000e+00 : f32
    %28 = vector.broadcast %cst_12 : f32 to vector<8x128xf32>
    %29 = arith.addf %28, %27 : vector<8x128xf32>
    %30 = arith.divf %28, %29 : vector<8x128xf32>
    %31 = math.tanh %25 : vector<8x128xf32>
    %32 = vector.extract_strided_slice %30 {offsets = [0, 0], sizes = [8, 32], strides = [1, 1]} : vector<8x128xf32> to vector<8x32xf32>
    %33 = vector.extract_strided_slice %30 {offsets = [0, 32], sizes = [8, 32], strides = [1, 1]} : vector<8x128xf32> to vector<8x32xf32>
    %34 = vector.extract_strided_slice %31 {offsets = [0, 64], sizes = [8, 32], strides = [1, 1]} : vector<8x128xf32> to vector<8x32xf32>
    %35 = vector.extract_strided_slice %30 {offsets = [0, 96], sizes = [8, 32], strides = [1, 1]} : vector<8x128xf32> to vector<8x32xf32>
    %36 = arith.mulf %33, %24 : vector<8x32xf32>
    %37 = arith.mulf %32, %34 : vector<8x32xf32>
    %38 = arith.addf %36, %37 : vector<8x32xf32>
    %39 = math.tanh %38 : vector<8x32xf32>
    %40 = arith.mulf %35, %39 : vector<8x32xf32>
    %41 = vector.extract_strided_slice %17 {offsets = [8, 0], sizes = [8, 128], strides = [1, 1]} : vector<32x128xf32> to vector<8x128xf32>
    %cst_13 = arith.constant dense<0.000000e+00> : vector<8x128xf32>
    %42 = tpu.matmul %40, %6, %cst_13 {dimension_numbers = #tpu.dot_dimension_numbers<[1], [0], [0], [1], [0, 0, 1, 1], [], []>} : vector<8x32xf32>, vector<32x128xf32>, vector<8x128xf32> -> vector<8x128xf32>
    %43 = arith.addf %41, %42 : vector<8x128xf32>
    %44 = arith.negf %43 : vector<8x128xf32>
    %45 = math.exp %44 : vector<8x128xf32>
    %cst_14 = arith.constant 1.000000e+00 : f32
    %46 = vector.broadcast %cst_14 : f32 to vector<8x128xf32>
    %47 = arith.addf %46, %45 : vector<8x128xf32>
    %48 = arith.divf %46, %47 : vector<8x128xf32>
    %49 = math.tanh %43 : vector<8x128xf32>
    %50 = vector.extract_strided_slice %48 {offsets = [0, 0], sizes = [8, 32], strides = [1, 1]} : vector<8x128xf32> to vector<8x32xf32>
    %51 = vector.extract_strided_slice %48 {offsets = [0, 32], sizes = [8, 32], strides = [1, 1]} : vector<8x128xf32> to vector<8x32xf32>
    %52 = vector.extract_strided_slice %49 {offsets = [0, 64], sizes = [8, 32], strides = [1, 1]} : vector<8x128xf32> to vector<8x32xf32>
    %53 = vector.extract_strided_slice %48 {offsets = [0, 96], sizes = [8, 32], strides = [1, 1]} : vector<8x128xf32> to vector<8x32xf32>
    %54 = arith.mulf %51, %38 : vector<8x32xf32>
    %55 = arith.mulf %50, %52 : vector<8x32xf32>
    %56 = arith.addf %54, %55 : vector<8x32xf32>
    %57 = math.tanh %56 : vector<8x32xf32>
    %58 = arith.mulf %53, %57 : vector<8x32xf32>
    %59 = vector.extract_strided_slice %17 {offsets = [16, 0], sizes = [8, 128], strides = [1, 1]} : vector<32x128xf32> to vector<8x128xf32>
    %cst_15 = arith.constant dense<0.000000e+00> : vector<8x128xf32>
    %60 = tpu.matmul %58, %6, %cst_15 {dimension_numbers = #tpu.dot_dimension_numbers<[1], [0], [0], [1], [0, 0, 1, 1], [], []>} : vector<8x32xf32>, vector<32x128xf32>, vector<8x128xf32> -> vector<8x128xf32>
    %61 = arith.addf %59, %60 : vector<8x128xf32>
    %62 = arith.negf %61 : vector<8x128xf32>
    %63 = math.exp %62 : vector<8x128xf32>
    %cst_16 = arith.constant 1.000000e+00 : f32
    %64 = vector.broadcast %cst_16 : f32 to vector<8x128xf32>
    %65 = arith.addf %64, %63 : vector<8x128xf32>
    %66 = arith.divf %64, %65 : vector<8x128xf32>
    %67 = math.tanh %61 : vector<8x128xf32>
    %68 = vector.extract_strided_slice %66 {offsets = [0, 0], sizes = [8, 32], strides = [1, 1]} : vector<8x128xf32> to vector<8x32xf32>
    %69 = vector.extract_strided_slice %66 {offsets = [0, 32], sizes = [8, 32], strides = [1, 1]} : vector<8x128xf32> to vector<8x32xf32>
    %70 = vector.extract_strided_slice %67 {offsets = [0, 64], sizes = [8, 32], strides = [1, 1]} : vector<8x128xf32> to vector<8x32xf32>
    %71 = vector.extract_strided_slice %66 {offsets = [0, 96], sizes = [8, 32], strides = [1, 1]} : vector<8x128xf32> to vector<8x32xf32>
    %72 = arith.mulf %69, %56 : vector<8x32xf32>
    %73 = arith.mulf %68, %70 : vector<8x32xf32>
    %74 = arith.addf %72, %73 : vector<8x32xf32>
    %75 = math.tanh %74 : vector<8x32xf32>
    %76 = arith.mulf %71, %75 : vector<8x32xf32>
    %77 = vector.extract_strided_slice %17 {offsets = [24, 0], sizes = [8, 128], strides = [1, 1]} : vector<32x128xf32> to vector<8x128xf32>
    %cst_17 = arith.constant dense<0.000000e+00> : vector<8x128xf32>
    %78 = tpu.matmul %76, %6, %cst_17 {dimension_numbers = #tpu.dot_dimension_numbers<[1], [0], [0], [1], [0, 0, 1, 1], [], []>} : vector<8x32xf32>, vector<32x128xf32>, vector<8x128xf32> -> vector<8x128xf32>
    %79 = arith.addf %77, %78 : vector<8x128xf32>
    %80 = arith.negf %79 : vector<8x128xf32>
    %81 = math.exp %80 : vector<8x128xf32>
    %cst_18 = arith.constant 1.000000e+00 : f32
    %82 = vector.broadcast %cst_18 : f32 to vector<8x128xf32>
    %83 = arith.addf %82, %81 : vector<8x128xf32>
    %84 = arith.divf %82, %83 : vector<8x128xf32>
    %85 = math.tanh %79 : vector<8x128xf32>
    %86 = vector.extract_strided_slice %84 {offsets = [0, 0], sizes = [8, 32], strides = [1, 1]} : vector<8x128xf32> to vector<8x32xf32>
    %87 = vector.extract_strided_slice %84 {offsets = [0, 32], sizes = [8, 32], strides = [1, 1]} : vector<8x128xf32> to vector<8x32xf32>
    %88 = vector.extract_strided_slice %85 {offsets = [0, 64], sizes = [8, 32], strides = [1, 1]} : vector<8x128xf32> to vector<8x32xf32>
    %89 = vector.extract_strided_slice %84 {offsets = [0, 96], sizes = [8, 32], strides = [1, 1]} : vector<8x128xf32> to vector<8x32xf32>
    %90 = arith.mulf %87, %74 : vector<8x32xf32>
    %91 = arith.mulf %86, %88 : vector<8x32xf32>
    %92 = arith.addf %90, %91 : vector<8x32xf32>
    %93 = math.tanh %92 : vector<8x32xf32>
    %94 = arith.mulf %89, %93 : vector<8x32xf32>
    %cst_19 = arith.constant dense<0.000000e+00> : vector<8x128xf32>
    %95 = tpu.matmul %94, %6, %cst_19 {dimension_numbers = #tpu.dot_dimension_numbers<[1], [0], [0], [1], [0, 0, 1, 1], [], []>} : vector<8x32xf32>, vector<32x128xf32>, vector<8x128xf32> -> vector<8x128xf32>
    %96 = arith.addf %23, %95 : vector<8x128xf32>
    %97 = arith.negf %96 : vector<8x128xf32>
    %98 = math.exp %97 : vector<8x128xf32>
    %cst_20 = arith.constant 1.000000e+00 : f32
    %99 = vector.broadcast %cst_20 : f32 to vector<8x128xf32>
    %100 = arith.addf %99, %98 : vector<8x128xf32>
    %101 = arith.divf %99, %100 : vector<8x128xf32>
    %102 = math.tanh %96 : vector<8x128xf32>
    %103 = vector.extract_strided_slice %101 {offsets = [0, 0], sizes = [8, 32], strides = [1, 1]} : vector<8x128xf32> to vector<8x32xf32>
    %104 = vector.extract_strided_slice %101 {offsets = [0, 32], sizes = [8, 32], strides = [1, 1]} : vector<8x128xf32> to vector<8x32xf32>
    %105 = vector.extract_strided_slice %102 {offsets = [0, 64], sizes = [8, 32], strides = [1, 1]} : vector<8x128xf32> to vector<8x32xf32>
    %106 = vector.extract_strided_slice %101 {offsets = [0, 96], sizes = [8, 32], strides = [1, 1]} : vector<8x128xf32> to vector<8x32xf32>
    %107 = arith.mulf %104, %92 : vector<8x32xf32>
    %108 = arith.mulf %103, %105 : vector<8x32xf32>
    %109 = arith.addf %107, %108 : vector<8x32xf32>
    %110 = math.tanh %109 : vector<8x32xf32>
    %111 = arith.mulf %106, %110 : vector<8x32xf32>
    %cst_21 = arith.constant dense<0.000000e+00> : vector<8x128xf32>
    %112 = tpu.matmul %111, %6, %cst_21 {dimension_numbers = #tpu.dot_dimension_numbers<[1], [0], [0], [1], [0, 0, 1, 1], [], []>} : vector<8x32xf32>, vector<32x128xf32>, vector<8x128xf32> -> vector<8x128xf32>
    %113 = arith.addf %23, %112 : vector<8x128xf32>
    %114 = arith.negf %113 : vector<8x128xf32>
    %115 = math.exp %114 : vector<8x128xf32>
    %cst_22 = arith.constant 1.000000e+00 : f32
    %116 = vector.broadcast %cst_22 : f32 to vector<8x128xf32>
    %117 = arith.addf %116, %115 : vector<8x128xf32>
    %118 = arith.divf %116, %117 : vector<8x128xf32>
    %119 = math.tanh %113 : vector<8x128xf32>
    %120 = vector.extract_strided_slice %118 {offsets = [0, 0], sizes = [8, 32], strides = [1, 1]} : vector<8x128xf32> to vector<8x32xf32>
    %121 = vector.extract_strided_slice %118 {offsets = [0, 32], sizes = [8, 32], strides = [1, 1]} : vector<8x128xf32> to vector<8x32xf32>
    %122 = vector.extract_strided_slice %119 {offsets = [0, 64], sizes = [8, 32], strides = [1, 1]} : vector<8x128xf32> to vector<8x32xf32>
    %123 = vector.extract_strided_slice %118 {offsets = [0, 96], sizes = [8, 32], strides = [1, 1]} : vector<8x128xf32> to vector<8x32xf32>
    %124 = arith.mulf %121, %109 : vector<8x32xf32>
    %125 = arith.mulf %120, %122 : vector<8x32xf32>
    %126 = arith.addf %124, %125 : vector<8x32xf32>
    %127 = math.tanh %126 : vector<8x32xf32>
    %128 = arith.mulf %123, %127 : vector<8x32xf32>
    %cst_23 = arith.constant dense<0.000000e+00> : vector<8x128xf32>
    %129 = tpu.matmul %128, %6, %cst_23 {dimension_numbers = #tpu.dot_dimension_numbers<[1], [0], [0], [1], [0, 0, 1, 1], [], []>} : vector<8x32xf32>, vector<32x128xf32>, vector<8x128xf32> -> vector<8x128xf32>
    %130 = arith.addf %23, %129 : vector<8x128xf32>
    %131 = arith.negf %130 : vector<8x128xf32>
    %132 = math.exp %131 : vector<8x128xf32>
    %cst_24 = arith.constant 1.000000e+00 : f32
    %133 = vector.broadcast %cst_24 : f32 to vector<8x128xf32>
    %134 = arith.addf %133, %132 : vector<8x128xf32>
    %135 = arith.divf %133, %134 : vector<8x128xf32>
    %136 = math.tanh %130 : vector<8x128xf32>
    %137 = vector.extract_strided_slice %135 {offsets = [0, 0], sizes = [8, 32], strides = [1, 1]} : vector<8x128xf32> to vector<8x32xf32>
    %138 = vector.extract_strided_slice %135 {offsets = [0, 32], sizes = [8, 32], strides = [1, 1]} : vector<8x128xf32> to vector<8x32xf32>
    %139 = vector.extract_strided_slice %136 {offsets = [0, 64], sizes = [8, 32], strides = [1, 1]} : vector<8x128xf32> to vector<8x32xf32>
    %140 = vector.extract_strided_slice %135 {offsets = [0, 96], sizes = [8, 32], strides = [1, 1]} : vector<8x128xf32> to vector<8x32xf32>
    %141 = arith.mulf %138, %126 : vector<8x32xf32>
    %142 = arith.mulf %137, %139 : vector<8x32xf32>
    %143 = arith.addf %141, %142 : vector<8x32xf32>
    %144 = math.tanh %143 : vector<8x32xf32>
    %145 = arith.mulf %140, %144 : vector<8x32xf32>
    %cst_25 = arith.constant dense<0.000000e+00> : vector<8x128xf32>
    %146 = tpu.matmul %145, %6, %cst_25 {dimension_numbers = #tpu.dot_dimension_numbers<[1], [0], [0], [1], [0, 0, 1, 1], [], []>} : vector<8x32xf32>, vector<32x128xf32>, vector<8x128xf32> -> vector<8x128xf32>
    %147 = arith.addf %23, %146 : vector<8x128xf32>
    %148 = arith.negf %147 : vector<8x128xf32>
    %149 = math.exp %148 : vector<8x128xf32>
    %cst_26 = arith.constant 1.000000e+00 : f32
    %150 = vector.broadcast %cst_26 : f32 to vector<8x128xf32>
    %151 = arith.addf %150, %149 : vector<8x128xf32>
    %152 = arith.divf %150, %151 : vector<8x128xf32>
    %153 = math.tanh %147 : vector<8x128xf32>
    %154 = vector.extract_strided_slice %152 {offsets = [0, 0], sizes = [8, 32], strides = [1, 1]} : vector<8x128xf32> to vector<8x32xf32>
    %155 = vector.extract_strided_slice %152 {offsets = [0, 32], sizes = [8, 32], strides = [1, 1]} : vector<8x128xf32> to vector<8x32xf32>
    %156 = vector.extract_strided_slice %153 {offsets = [0, 64], sizes = [8, 32], strides = [1, 1]} : vector<8x128xf32> to vector<8x32xf32>
    %157 = vector.extract_strided_slice %152 {offsets = [0, 96], sizes = [8, 32], strides = [1, 1]} : vector<8x128xf32> to vector<8x32xf32>
    %158 = arith.mulf %155, %143 : vector<8x32xf32>
    %159 = arith.mulf %154, %156 : vector<8x32xf32>
    %160 = arith.addf %158, %159 : vector<8x32xf32>
    %161 = math.tanh %160 : vector<8x32xf32>
    %162 = arith.mulf %157, %161 : vector<8x32xf32>
    %163 = tpu.concatenate %111, %128, %145, %162 in 0 : vector<8x32xf32>, vector<8x32xf32>, vector<8x32xf32>, vector<8x32xf32> -> vector<32x32xf32>
    %cst_27 = arith.constant dense<0.000000e+00> : vector<32x2xf32>
    %164 = tpu.matmul %163, %7, %cst_27 {dimension_numbers = #tpu.dot_dimension_numbers<[1], [0], [0], [1], [0, 0, 1, 1], [], []>} : vector<32x32xf32>, vector<32x2xf32>, vector<32x2xf32> -> vector<32x2xf32>
    %165 = vector.broadcast %4 : vector<1x2xf32> to vector<32x2xf32>
    %166 = arith.addf %164, %165 : vector<32x2xf32>
    %167 = vector.extract_strided_slice %8 {offsets = [32, 0], sizes = [32, 2], strides = [1, 1]} : vector<64x8xf32> to vector<32x2xf32>
    %168 = arith.subf %166, %167 : vector<32x2xf32>
    %169 = arith.mulf %168, %168 : vector<32x2xf32>
    %cst_28 = arith.constant dense<0.000000e+00> : vector<32xf32>
    %170 = vector.multi_reduction <add>, %169, %cst_28 [1] : vector<32x2xf32> to vector<32xf32>
    %171 = vector.shape_cast %170 : vector<32xf32> to vector<32x1xf32>
    %172 = math.sqrt %171 : vector<32x1xf32>
    %cst_29 = arith.constant dense<0.000000e+00> : vector<1xf32>
    %173 = vector.multi_reduction <add>, %172, %cst_29 [0] : vector<32x1xf32> to vector<1xf32>
    %174 = vector.shape_cast %173 : vector<1xf32> to vector<1x1xf32>
    %cst_30 = arith.constant 1.250000e-01 : f32
    %175 = vector.broadcast %cst_30 : f32 to vector<1x1xf32>
    %176 = arith.mulf %174, %175 : vector<1x1xf32>
    %c0_31 = arith.constant 0 : index
    %c0_32 = arith.constant 0 : index
    %177 = vector.load %arg2[%c0_31, %c0_32] : memref<40x2xf32, #tpu.memory_space<vmem>>, vector<32x2xf32>
    tpu.vector_store %arg2[%c0_31, %c0_32], %166 {strides = array<i32>} : memref<40x2xf32, #tpu.memory_space<vmem>>, vector<32x2xf32>,
    %178 = vector.shape_cast %176 : vector<1x1xf32> to vector<1x1xf32>
    %179 = vector.broadcast %178 : vector<1x1xf32> to vector<8x2xf32>
    %c32 = arith.constant 32 : index
    %c0_33 = arith.constant 0 : index
    %180 = vector.load %arg2[%c32, %c0_33] : memref<40x2xf32, #tpu.memory_space<vmem>>, vector<8x2xf32>
    tpu.vector_store %arg2[%c32, %c0_33], %179 {strides = array<i32>} : memref<40x2xf32, #tpu.memory_space<vmem>>, vector<8x2xf32>,
    return
  }
}

</mosaic_0001>

<bundles_post_ra>
// kernel: _forward_impl.1
= control target key start
LH: loop header
LB: loop body
LE: loop exit
PB: predicated region body
PF: predicated region fallthrough
CT: control target
= control target key end

     0   :  { %vm34_vm0 = vcmask 64512   ;;  %vm81_vm1 = vcmask 261120   ;;  %s857_s25 = smov 64   ;;  %s858_s26 = smov 32   ;;  %s1098_s1 = inlined_call_operand.vmem [shape: f32[112,128], index: 1, kind: input, shape index: {}]   ;;  %s1099_s0 = inlined_call_operand.vmem [shape: f32[64,8], index: 0, kind: input, shape index: {}]   ;;  %s1100_s2 = inlined_call_operand.vmem [shape: f32[40,2], index: 2, kind: output, shape index: {}]  }
   0x1   :  { %v11_v0 = vld [vmem:[%s1098_s1] sm:$0xff]  ;;  %v26_v2 = vld [vmem:[%s1099_s0 + $0x8] sm:$0xff]  ;;  %v14_v5 = vld [vmem:[%s1098_s1 + $0x18] sm:$0xff] }
   0x2   :  { %v25_v1 = vld [vmem:[%s1099_s0] sm:$0xff]  ;;  %62 = vmatpush.msra.mxu0 %v11_v0  ;;  %780 = vmatpush.msra.mxu1 %v11_v0  ;;  %v16_v3 = vld [vmem:[%s1098_s1 + $0x28] sm:$0xff]  ;;  %v13_v6 = vld [vmem:[%s1098_s1 + $0x10] sm:$0xff] }
   0x3   :  { %752 = vmatmul.msk.f32.vlgmr.msra.gmra.mxu0 %vm34_vm0, %v25_v1  ;;  %753 = vmatmul.msk.f32.vlgmr.msra.gmra.mxu1 %vm34_vm0, %v26_v2  ;;  %v15_v4 = vld [vmem:[%s1098_s1 + $0x20] sm:$0xff]  ;;  %v900_v7 = vld [vmem:[%s1098_s1 + $0x8] sm:$0xff]  ;;  %v27_v38 = vld [vmem:[%s1099_s0 + $0x10] sm:$0xff] }
   0x4   :  { %106 = vmatpush.msrb.mxu1 %v16_v3  ;;  %781 = vmatpush.msra.mxu2 %v11_v0  ;;  %v903_v8 = vperm.slane %v900_v7, 0  ;;  %v910_v15 = vperm.slane %v900_v7, 1  ;;  %v28_v39 = vld [vmem:[%s1099_s0 + $0x18] sm:$0xff]  ;;  %v928_v40 = vld [vmem:[%s1098_s1 + $0x48] sm:$0xff]  ;;  %v935_v41 = vld [vmem:[%s1098_s1 + $0x40] sm:$0xff] }
   0x5   :  { %782 = vmatpush.msra.mxu3 %v11_v0  ;;  %754 = vmatmul.msk.f32.vlgmr.msra.gmra.mxu2 %vm34_vm0, %v27_v38  ;;  %v942_v42 = vld [vmem:[%s1098_s1 + $0x38] sm:$0xff]  ;;  %v949_v43 = vld [vmem:[%s1098_s1 + $0x30] sm:$0xff] }
   0x6   :  { %142 = vmatpush.msrb.mxu2 %v16_v3  ;;  %107 = vmatpush.msrb.mxu1 %v15_v4 }
   0x7   :  { %755 = vmatmul.msk.f32.vlgmr.msra.gmra.mxu3 %vm34_vm0, %v28_v39 }
   0x8   :  { %143 = vmatpush.msrb.mxu2 %v15_v4  ;;  %108 = vmatpush.msrb.mxu1 %v14_v5 }
   0x9   :  { %205 = vmatpush.msrb.mxu3 %v928_v40 }
   0xa   :  { %144 = vmatpush.msrb.mxu2 %v14_v5  ;;  %109 = vmatpush.msrb.mxu1 %v13_v6 }
   0xb   :  { %206 = vmatpush.msrb.mxu3 %v935_v41 }
   0xc   :  { %145 = vmatpush.msrb.mxu2 %v13_v6 }
   0xd   :  { %207 = vmatpush.msrb.mxu3 %v942_v42 }
   0xe   :  { %268 = vmatpush.msra.mxu2 %v928_v40 }
   0xf   :  { %208 = vmatpush.msrb.mxu3 %v949_v43 }
  0x10   :  { %269 = vmatpush.msra.mxu2 %v935_v41 }
  0x11   :  { %331 = vmatpush.msra.mxu3 %v928_v40 }
  0x12   :  { %270 = vmatpush.msra.mxu2 %v942_v42 }
  0x13   :  { %332 = vmatpush.msra.mxu3 %v935_v41 }
  0x14   :  { %271 = vmatpush.msra.mxu2 %v949_v43 }
  0x15   :  { %333 = vmatpush.msra.mxu3 %v942_v42 }
  0x17   :  { %334 = vmatpush.msra.mxu3 %v949_v43 }
  0x80   :  { %v64_v9 = vpop.f32.mrf.mxu0  ;;  %v67_v11 = vpop.f32.mrf.mxu1 }
  0x81   :  { %v65_v10 = vadd.f32 %v64_v9, %v903_v8  ;;  %v68_v13 = vadd.f32 %v67_v11, %v903_v8 }
  0x83   :  { %v76_v12 = vmax.f32 %v65_v10, 0.0  ;;  %v77_v14 = vmax.f32 %v68_v13, 0.0 }
  0x85   :  { %756 = vmatmul.msk.f32.vlgmr.msrb.gmra.mxu1 %vm81_vm1, %v76_v12 }
  0x88   :  { %v70_v46 = vpop.f32.mrf.mxu2 }
  0x89   :  { %v71_v47 = vadd.f32 %v70_v46, %v903_v8 }
  0x8a   :  { %v73_v48 = vpop.f32.mrf.mxu3 }
  0x8b   :  { %v78_v49 = vmax.f32 %v71_v47, 0.0  ;;  %v74_v50 = vadd.f32 %v73_v48, %v903_v8 }
  0x8d   :  { %757 = vmatmul.msk.f32.gmra.mxu1 %vm81_vm1, %v77_v14  ;;  %v79_v51 = vmax.f32 %v74_v50, 0.0  ;;  %v123_v14 = vmax.f32 %v900_v7, 0.0 }
  0x8f   :  { %760 = vmatmul.msk.f32.vlgmr.msrb.gmra.mxu2 %vm81_vm1, %v123_v14 }
  0x90   :  { %394 = vmatpush.msrb.mxu2 %v928_v40 }
  0x92   :  { %395 = vmatpush.msrb.mxu2 %v935_v41 }
  0x94   :  { %396 = vmatpush.msrb.mxu2 %v942_v42 }
  0x95   :  { %758 = vmatmul.msk.f32.gmra.mxu1 %vm81_vm1, %v78_v49 }
  0x96   :  { %397 = vmatpush.msrb.mxu2 %v949_v43 }
  0x9d   :  { %759 = vmatmul.msk.f32.gmra.mxu1 %vm81_vm1, %v79_v51 }
 0x102   :  { %v111_v16 = vpop.f32.mrf.mxu1 }
 0x103   :  { %v112_v17 = vadd.f32 %v111_v16, %v910_v15 }
 0x105   :  { %785 = vtanh.f32 %v112_v17  ;;  %v761_v19 = vmul.f32 -1.442695, %v112_v17 }
 0x107   :  { %787 = vpow2.f32 %v761_v19 }
 0x10a   :  { %v114_v53 = vpop.f32.mrf.mxu1 }
 0x10b   :  { %v786_v18 = vpop.eup %785  ;;  %v115_v54 = vadd.f32 %v114_v53, %v910_v15 }
 0x10c   :  { %173 = vrot.lane.b32.xlu0 %v786_v18, %s857_s25 }
 0x10d   :  { %v788_v20 = vpop.eup %787 }
 0x10e   :  { %v154_v21 = vadd.f32 1.0, %v788_v20 }
 0x110   :  { %789 = vrcp.f32 %v154_v21  ;;  %v166_v27 = vand.u32 2147483648, %v154_v21  ;;  %vm160_vm3 = vweird.f32 %v154_v21  ;;  %v164_v28 = vand.u32 2147483647, %v154_v21 }
 0x112   :  { %v167_v30 = vor.u32 1.1754944e-38, %v166_v27  ;;  %vm165_vm5 = vcmp.eq.f32.partialorder %v164_v28, 8.507059e+37  ;;  %v986_v19 = vpop.f32.mrf.mxu2  ;;  %v117_v20 = vpop.f32.mrf.mxu1 }
 0x116   :  { %v790_v22 = vpop.eup %789 }
 0x117   :  { %v156_v23 = vmul.f32 %v790_v22, %v154_v21  ;;  %vm161_vm2 = vweird.f32 %v790_v22  ;;  %v118_v21 = vadd.f32 %v117_v20, %v910_v15 }
 0x118   :  { %vm162_vm4 = vmor %vm160_vm3, %vm161_vm2 }
 0x119   :  { %v157_v24 = vsub.f32 1.0, %v156_v23 }
 0x11a   :  { %v120_v51 = vpop.f32.mrf.mxu1 }
 0x11b   :  { %v158_v25 = vmul.f32 %v790_v22, %v157_v24 }
 0x11d   :  { %v159_v26 = vadd.f32 %v790_v22, %v158_v25 }
 0x11f   :  { %v163_v29 = vsel %vm162_vm4, %v790_v22, %v159_v26 }
 0x120   :  { %v168_v32 = vsel %vm165_vm5, %v167_v30, %v163_v29 }
 0x121   :  { %v171_v34 = vmul.f32 0.0, %v168_v32 }
 0x17e   :  { %v174_v31 = vpop.permute.xlu0 %173 }
 0x17f   :  { %v176_v33 = vmul.f32 %v174_v31, %v168_v32 }
 0x181   :  { %178 = vrot.lane.b32.xlu0 %v176_v33, %s858_s26 }
 0x1f3   :  { %v179_v35 = vpop.permute.xlu0 %178 }
 0x1f4   :  { %v915_v36 = vadd.f32 %v179_v35, %v171_v34 }
 0x1f6   :  { %791 = vtanh.f32 %v915_v36 }
 0x1fc   :  { %v792_v37 = vpop.eup %791 }
 0x1fd   :  { %184 = vrot.lane.b32.xlu1 %v792_v37, %s857_s25 }
 0x26f   :  { %v185_v44 = vpop.permute.xlu1 %184 }
 0x270   :  { %v187_v45 = vmul.f32 %v185_v44, %v168_v32 }
 0x272   :  { %189 = vrot.lane.b32.xlu1 %v187_v45, %s858_s26 }
 0x2e4   :  { %v190_v52 = vpop.permute.xlu1 %189 }
 0x2e5   :  { %762 = vmatmul.msk.f32.vlgmr.msrb.gmra.mxu3 %vm81_vm1, %v190_v52  ;;  %v121_v52 = vadd.f32 %v120_v51, %v910_v15 }
 0x2e6   :  { %457 = vmatpush.msrb.mxu3 %v928_v40 }
 0x2e8   :  { %458 = vmatpush.msrb.mxu3 %v935_v41 }
 0x2ea   :  { %459 = vmatpush.msrb.mxu3 %v942_v42 }
 0x2ec   :  { %460 = vmatpush.msrb.mxu3 %v949_v43 }
 0x368   :  { %v210_v55 = vpop.f32.mrf.mxu3 }
 0x369   :  { %v213_v56 = vadd.f32 %v210_v55, %v115_v54 }
 0x36b   :  { %793 = vtanh.f32 %v213_v56  ;;  %v763_v58 = vmul.f32 -1.442695, %v213_v56 }
 0x36d   :  { %795 = vpow2.f32 %v763_v58 }
 0x371   :  { %v794_v57 = vpop.eup %793 }
 0x372   :  { %236 = vrot.lane.b32.xlu2 %v794_v57, %s857_s25 }
 0x373   :  { %v796_v59 = vpop.eup %795 }
 0x374   :  { %v217_v60 = vadd.f32 1.0, %v796_v59 }
 0x376   :  { %797 = vrcp.f32 %v217_v60  ;;  %v229_v2 = vand.u32 2147483648, %v217_v60  ;;  %vm223_vm7 = vweird.f32 %v217_v60  ;;  %v227_v3 = vand.u32 2147483647, %v217_v60 }
 0x378   :  { %v230_v5 = vor.u32 1.1754944e-38, %v229_v2  ;;  %vm228_vm9 = vcmp.eq.f32.partialorder %v227_v3, 8.507059e+37 }
 0x37c   :  { %v798_v61 = vpop.eup %797 }
 0x37d   :  { %v219_v62 = vmul.f32 %v798_v61, %v217_v60  ;;  %vm224_vm6 = vweird.f32 %v798_v61 }
 0x37e   :  { %vm225_vm8 = vmor %vm223_vm7, %vm224_vm6  ;;  %vm672_vm7 = vcmask 15360  }
 0x37f   :  { %v220_v63 = vsub.f32 1.0, %v219_v62 }
 0x381   :  { %v221_v0 = vmul.f32 %v798_v61, %v220_v63 }
 0x383   :  { %v222_v1 = vadd.f32 %v798_v61, %v221_v0 }
 0x385   :  { %v226_v4 = vsel %vm225_vm8, %v798_v61, %v222_v1 }
 0x386   :  { %v231_v8 = vsel %vm228_vm9, %v230_v5, %v226_v4 }
 0x387   :  { %v234_v10 = vmul.f32 %v231_v8, %v915_v36 }
 0x3cc   :  { %v237_v6 = vpop.permute.xlu2 %236 }
 0x3cd   :  { %v239_v9 = vmul.f32 %v237_v6, %v231_v8 }
 0x3cf   :  { %241 = vrot.lane.b32.xlu2 %v239_v9, %s858_s26 }
 0x429   :  { %v242_v11 = vpop.permute.xlu2 %241 }
 0x42a   :  { %v244_v12 = vadd.f32 %v242_v11, %v234_v10  ;;  %v125_v10 = vrot.slane %v900_v7, 1 }
 0x42c   :  { %799 = vtanh.f32 %v244_v12  ;;  %v148_v11 = vadd.f32 %v986_v19, %v125_v10 }
 0x432   :  { %v800_v13 = vpop.eup %799 }
 0x433   :  { %247 = vrot.lane.b32.xlu0 %v800_v13, %s857_s25 }
 0x4a5   :  { %v248_v16 = vpop.permute.xlu0 %247 }
 0x4a6   :  { %v250_v17 = vmul.f32 %v248_v16, %v231_v8 }
 0x4a8   :  { %252 = vrot.lane.b32.xlu1 %v250_v17, %s858_s26 }
 0x51a   :  { %v253_v18 = vpop.permute.xlu1 %252 }
 0x51b   :  { %764 = vmatmul.msk.f32.vlgmr.msra.gmra.mxu2 %vm81_vm1, %v253_v18 }
 0x51c   :  { %520 = vmatpush.msra.mxu2 %v928_v40 }
 0x51e   :  { %521 = vmatpush.msra.mxu2 %v935_v41 }
 0x520   :  { %522 = vmatpush.msra.mxu2 %v942_v42 }
 0x522   :  { %523 = vmatpush.msra.mxu2 %v949_v43 }
 0x59e   :  { %v273_v22 = vpop.f32.mrf.mxu2 }
 0x59f   :  { %v276_v23 = vadd.f32 %v273_v22, %v118_v21 }
 0x5a1   :  { %801 = vtanh.f32 %v276_v23  ;;  %v765_v25 = vmul.f32 -1.442695, %v276_v23 }
 0x5a3   :  { %803 = vpow2.f32 %v765_v25 }
 0x5a7   :  { %v802_v24 = vpop.eup %801 }
 0x5a8   :  { %299 = vrot.lane.b32.xlu2 %v802_v24, %s857_s25 }
 0x5a9   :  { %v804_v26 = vpop.eup %803 }
 0x5aa   :  { %v280_v27 = vadd.f32 1.0, %v804_v26 }
 0x5ac   :  { %805 = vrcp.f32 %v280_v27  ;;  %v292_v33 = vand.u32 2147483648, %v280_v27  ;;  %vm286_vm11 = vweird.f32 %v280_v27  ;;  %v290_v34 = vand.u32 2147483647, %v280_v27 }
 0x5ae   :  { %v293_v36 = vor.u32 1.1754944e-38, %v292_v33  ;;  %vm291_vm13 = vcmp.eq.f32.partialorder %v290_v34, 8.507059e+37 }
 0x5b2   :  { %v806_v28 = vpop.eup %805 }
 0x5b3   :  { %v282_v29 = vmul.f32 %v806_v28, %v280_v27  ;;  %vm287_vm10 = vweird.f32 %v806_v28 }
 0x5b4   :  { %vm288_vm12 = vmor %vm286_vm11, %vm287_vm10 }
 0x5b5   :  { %v283_v30 = vsub.f32 1.0, %v282_v29 }
 0x5b7   :  { %v284_v31 = vmul.f32 %v806_v28, %v283_v30 }
 0x5b9   :  { %v285_v32 = vadd.f32 %v806_v28, %v284_v31 }
 0x5bb   :  { %v289_v35 = vsel %vm288_vm12, %v806_v28, %v285_v32 }
 0x5bc   :  { %v294_v38 = vsel %vm291_vm13, %v293_v36, %v289_v35  ;;  %v24_v36 = vld [vmem:[%s1098_s1 + $0x68] sm:$0xff] }
 0x5bd   :  { %v297_v44 = vmul.f32 %v294_v38, %v244_v12  ;;  %v1006_v12 = vperm.slane %v148_v11, 0  ;;  %647 = vmatpush.msrb.mxu0 %v24_v36 }
 0x602   :  { %v300_v37 = vpop.permute.xlu2 %299 }
 0x603   :  { %v302_v39 = vmul.f32 %v300_v37, %v294_v38  ;;  %v23_v37 = vld [vmem:[%s1098_s1 + $0x60] sm:$0xff] }
 0x604   :  { %648 = vmatpush.msrb.mxu0 %v23_v37 }
 0x605   :  { %304 = vrot.lane.b32.xlu0 %v302_v39, %s858_s26  ;;  %v21_v39 = vld [vmem:[%s1098_s1 + $0x50] sm:$0xff] }
 0x677   :  { %v305_v45 = vpop.permute.xlu0 %304 }
 0x678   :  { %v307_v46 = vadd.f32 %v305_v45, %v297_v44 }
 0x67a   :  { %807 = vtanh.f32 %v307_v46 }
 0x680   :  { %v808_v47 = vpop.eup %807 }
 0x681   :  { %310 = vrot.lane.b32.xlu1 %v808_v47, %s857_s25  ;;  %v1028_v47 = vperm.slane %v900_v7, 2 }
 0x6f3   :  { %v311_v48 = vpop.permute.xlu1 %310 }
 0x6f4   :  { %v313_v49 = vmul.f32 %v311_v48, %v294_v38  ;;  %v22_v38 = vld [vmem:[%s1098_s1 + $0x58] sm:$0xff] }
 0x6f5   :  { %649 = vmatpush.msrb.mxu0 %v22_v38 }
 0x6f6   :  { %315 = vrot.lane.b32.xlu2 %v313_v49, %s858_s26 }
 0x6f7   :  { %650 = vmatpush.msrb.mxu0 %v21_v39 }
 0x750   :  { %v316_v50 = vpop.permute.xlu2 %315 }
 0x751   :  { %766 = vmatmul.msk.f32.vlgmr.msra.gmra.mxu3 %vm81_vm1, %v316_v50 }
 0x752   :  { %583 = vmatpush.msra.mxu3 %v928_v40 }
 0x754   :  { %584 = vmatpush.msra.mxu3 %v935_v41 }
 0x756   :  { %585 = vmatpush.msra.mxu3 %v942_v42 }
 0x758   :  { %586 = vmatpush.msra.mxu3 %v949_v43 }
 0x7d4   :  { %v336_v53 = vpop.f32.mrf.mxu3 }
 0x7d5   :  { %v339_v54 = vadd.f32 %v336_v53, %v121_v52 }
 0x7d7   :  { %809 = vtanh.f32 %v339_v54  ;;  %v767_v56 = vmul.f32 -1.442695, %v339_v54 }
 0x7d9   :  { %811 = vpow2.f32 %v767_v56 }
 0x7dd   :  { %v810_v55 = vpop.eup %809 }
 0x7de   :  { %362 = vrot.lane.b32.xlu0 %v810_v55, %s857_s25 }
 0x7df   :  { %v812_v57 = vpop.eup %811 }
 0x7e0   :  { %v343_v58 = vadd.f32 1.0, %v812_v57 }
 0x7e2   :  { %813 = vrcp.f32 %v343_v58  ;;  %v355_v43 = vand.u32 2147483648, %v343_v58  ;;  %vm349_vm15 = vweird.f32 %v343_v58  ;;  %v353_v15 = vand.u32 2147483647, %v343_v58 }
 0x7e4   :  { %v356_v62 = vor.u32 1.1754944e-38, %v355_v43  ;;  %vm354_vm2 = vcmp.eq.f32.partialorder %v353_v15, 8.507059e+37 }
 0x7e8   :  { %v814_v40 = vpop.eup %813 }
 0x7e9   :  { %v345_v41 = vmul.f32 %v814_v40, %v343_v58  ;;  %vm350_vm14 = vweird.f32 %v814_v40 }
 0x7ea   :  { %vm351_vm0 = vmor %vm349_vm15, %vm350_vm14 }
 0x7eb   :  { %v346_v59 = vsub.f32 1.0, %v345_v41 }
 0x7ed   :  { %v347_v42 = vmul.f32 %v814_v40, %v346_v59 }
 0x7ef   :  { %v348_v60 = vadd.f32 %v814_v40, %v347_v42 }
 0x7f1   :  { %v352_v61 = vsel %vm351_vm0, %v814_v40, %v348_v60 }
 0x7f2   :  { %v357_v0 = vsel %vm354_vm2, %v356_v62, %v352_v61 }
 0x7f3   :  { %v360_v2 = vmul.f32 %v357_v0, %v307_v46 }
 0x850   :  { %v363_v63 = vpop.permute.xlu0 %362 }
 0x851   :  { %v365_v1 = vmul.f32 %v363_v63, %v357_v0 }
 0x853   :  { %367 = vrot.lane.b32.xlu1 %v365_v1, %s858_s26 }
 0x8c5   :  { %v368_v3 = vpop.permute.xlu1 %367 }
 0x8c6   :  { %v370_v4 = vadd.f32 %v368_v3, %v360_v2 }
 0x8c8   :  { %815 = vtanh.f32 %v370_v4 }
 0x8ce   :  { %v816_v5 = vpop.eup %815 }
 0x8cf   :  { %373 = vrot.lane.b32.xlu2 %v816_v5, %s857_s25 }
 0x929   :  { %v374_v6 = vpop.permute.xlu2 %373 }
 0x92a   :  { %v376_v8 = vmul.f32 %v374_v6, %v357_v0 }
 0x92c   :  { %378 = vrot.lane.b32.xlu0 %v376_v8, %s858_s26 }
 0x99e   :  { %v379_v9 = vpop.permute.xlu0 %378 }
 0x99f   :  { %768 = vmatmul.msk.f32.vlgmr.msrb.gmra.mxu2 %vm81_vm1, %v379_v9 }
 0xa22   :  { %v399_v13 = vpop.f32.mrf.mxu2 }
 0xa23   :  { %v402_v14 = vadd.f32 %v399_v13, %v1006_v12 }
 0xa25   :  { %817 = vtanh.f32 %v402_v14  ;;  %v769_v17 = vmul.f32 -1.442695, %v402_v14 }
 0xa27   :  { %819 = vpow2.f32 %v769_v17 }
 0xa2b   :  { %v818_v16 = vpop.eup %817 }
 0xa2c   :  { %425 = vrot.lane.b32.xlu1 %v818_v16, %s857_s25 }
 0xa2d   :  { %v820_v18 = vpop.eup %819 }
 0xa2e   :  { %v406_v20 = vadd.f32 1.0, %v820_v18 }
 0xa30   :  { %821 = vrcp.f32 %v406_v20  ;;  %v418_v19 = vand.u32 2147483648, %v406_v20  ;;  %vm412_vm4 = vweird.f32 %v406_v20  ;;  %v416_v26 = vand.u32 2147483647, %v406_v20 }
 0xa32   :  { %v419_v28 = vor.u32 1.1754944e-38, %v418_v19  ;;  %vm417_vm6 = vcmp.eq.f32.partialorder %v416_v26, 8.507059e+37 }
 0xa36   :  { %v822_v21 = vpop.eup %821 }
 0xa37   :  { %v408_v22 = vmul.f32 %v822_v21, %v406_v20  ;;  %vm413_vm3 = vweird.f32 %v822_v21 }
 0xa38   :  { %vm414_vm5 = vmor %vm412_vm4, %vm413_vm3 }
 0xa39   :  { %v409_v23 = vsub.f32 1.0, %v408_v22 }
 0xa3b   :  { %v410_v24 = vmul.f32 %v822_v21, %v409_v23 }
 0xa3d   :  { %v411_v25 = vadd.f32 %v822_v21, %v410_v24 }
 0xa3f   :  { %v415_v27 = vsel %vm414_vm5, %v822_v21, %v411_v25 }
 0xa40   :  { %v420_v30 = vsel %vm417_vm6, %v419_v28, %v415_v27 }
 0xa41   :  { %v423_v32 = vmul.f32 %v420_v30, %v370_v4 }
 0xa9e   :  { %v426_v29 = vpop.permute.xlu1 %425 }
 0xa9f   :  { %v428_v31 = vmul.f32 %v426_v29, %v420_v30 }
 0xaa1   :  { %430 = vrot.lane.b32.xlu2 %v428_v31, %s858_s26 }
 0xafb   :  { %v431_v33 = vpop.permute.xlu2 %430 }
 0xafc   :  { %v433_v34 = vadd.f32 %v431_v33, %v423_v32 }
 0xafe   :  { %823 = vtanh.f32 %v433_v34 }
 0xb04   :  { %v824_v35 = vpop.eup %823 }
 0xb05   :  { %436 = vrot.lane.b32.xlu0 %v824_v35, %s857_s25 }
 0xb77   :  { %v437_v44 = vpop.permute.xlu0 %436 }
 0xb78   :  { %v439_v45 = vmul.f32 %v437_v44, %v420_v30 }
 0xb7a   :  { %441 = vrot.lane.b32.xlu1 %v439_v45, %s858_s26 }
 0xbec   :  { %v442_v46 = vpop.permute.xlu1 %441 }
 0xbed   :  { %770 = vmatmul.msk.f32.vlgmr.msrb.gmra.mxu3 %vm81_vm1, %v442_v46  ;;  %776 = vmatmul.msk.f32.vlgmr.msrb.gmra.mxu0 %vm81_vm1, %v442_v46 }
 0xc6a   :  { %v652_v48 = vpop.f32.mrf.mxu0 }
 0xc6b   :  { %v1031_v49 = vadd.f32 %v652_v48, %v1028_v47 }
 0xc6d   :  { %743 = vst.msk [vmem:[%s1100_s2] sm:$0xff] %vm672_vm7, %v1031_v49 }
 0xc70   :  { %v462_v50 = vpop.f32.mrf.mxu3 }
 0xc71   :  { %v465_v51 = vadd.f32 %v462_v50, %v1006_v12 }
 0xc73   :  { %825 = vtanh.f32 %v465_v51  ;;  %v771_v7 = vmul.f32 -1.442695, %v465_v51 }
 0xc75   :  { %827 = vpow2.f32 %v771_v7 }
 0xc79   :  { %v826_v52 = vpop.eup %825 }
 0xc7a   :  { %488 = vrot.lane.b32.xlu2 %v826_v52, %s857_s25 }
 0xc7b   :  { %v828_v53 = vpop.eup %827 }
 0xc7c   :  { %v469_v54 = vadd.f32 1.0, %v828_v53 }
 0xc7e   :  { %829 = vrcp.f32 %v469_v54  ;;  %v481_v41 = vand.u32 2147483648, %v469_v54  ;;  %vm475_vm9 = vweird.f32 %v469_v54  ;;  %v479_v59 = vand.u32 2147483647, %v469_v54 }
 0xc80   :  { %v482_v60 = vor.u32 1.1754944e-38, %v481_v41  ;;  %vm480_vm11 = vcmp.eq.f32.partialorder %v479_v59, 8.507059e+37 }
 0xc84   :  { %v830_v55 = vpop.eup %829 }
 0xc85   :  { %v471_v56 = vmul.f32 %v830_v55, %v469_v54  ;;  %vm476_vm8 = vweird.f32 %v830_v55 }
 0xc86   :  { %vm477_vm10 = vmor %vm475_vm9, %vm476_vm8 }
 0xc87   :  { %v472_v57 = vsub.f32 1.0, %v471_v56 }
 0xc89   :  { %v473_v58 = vmul.f32 %v830_v55, %v472_v57 }
 0xc8b   :  { %v474_v40 = vadd.f32 %v830_v55, %v473_v58 }
 0xc8d   :  { %v478_v42 = vsel %vm477_vm10, %v830_v55, %v474_v40  ;;  %v29_v40 = vld [vmem:[%s1099_s0 + $0x20] sm:$0xff] }
 0xc8e   :  { %v483_v15 = vsel %vm480_vm11, %v482_v60, %v478_v42  ;;  %v664_v41 = vsub.f32 %v1031_v49, %v29_v40 }
 0xc8f   :  { %v486_v62 = vmul.f32 %v483_v15, %v433_v34 }
 0xc90   :  { %v668_v59 = vmul.f32 %v664_v41, %v664_v41 }
 0xc92   :  { %v673_v42 = vsel %vm672_vm7, %v668_v59, 0.0 }
 0xcd4   :  { %v489_v43 = vpop.permute.xlu2 %488 }
 0xcd5   :  { %v491_v61 = vmul.f32 %v489_v43, %v483_v15 }
 0xcd7   :  { %493 = vrot.lane.b32.xlu0 %v491_v61, %s858_s26 }
 0xd49   :  { %v494_v63 = vpop.permute.xlu0 %493 }
 0xd4a   :  { %v496_v0 = vadd.f32 %v494_v63, %v486_v62  ;;  %v30_v62 = vld [vmem:[%s1099_s0 + $0x28] sm:$0xff] }
 0xd4c   :  { %831 = vtanh.f32 %v496_v0 }
 0xd52   :  { %v832_v1 = vpop.eup %831 }
 0xd53   :  { %499 = vrot.lane.b32.xlu1 %v832_v1, %s857_s25 }
 0xdc5   :  { %v500_v2 = vpop.permute.xlu1 %499 }
 0xdc6   :  { %v502_v3 = vmul.f32 %v500_v2, %v483_v15 }
 0xdc8   :  { %504 = vrot.lane.b32.xlu2 %v502_v3, %s858_s26  ;;  %v31_v3 = vld [vmem:[%s1099_s0 + $0x30] sm:$0xff] }
 0xe22   :  { %v505_v4 = vpop.permute.xlu2 %504 }
 0xe23   :  { %772 = vmatmul.msk.f32.vlgmr.msra.gmra.mxu2 %vm81_vm1, %v505_v4  ;;  %777 = vmatmul.msk.f32.gmra.mxu0 %vm81_vm1, %v505_v4 }
 0xea0   :  { %v655_v5 = vpop.f32.mrf.mxu0 }
 0xea1   :  { %v1046_v6 = vadd.f32 %v655_v5, %v1028_v47 }
 0xea3   :  { %744 = vst.msk [vmem:[%s1100_s2 + $0x8] sm:$0xff] %vm672_vm7, %v1046_v6  ;;  %v665_v63 = vsub.f32 %v1046_v6, %v30_v62  ;;  %v32_v6 = vld [vmem:[%s1099_s0 + $0x38] sm:$0xff] }
 0xea6   :  { %v525_v8 = vpop.f32.mrf.mxu2 }
 0xea7   :  { %v528_v9 = vadd.f32 %v525_v8, %v1006_v12 }
 0xea9   :  { %833 = vtanh.f32 %v528_v9  ;;  %v773_v11 = vmul.f32 -1.442695, %v528_v9 }
 0xeab   :  { %835 = vpow2.f32 %v773_v11 }
 0xeaf   :  { %v834_v10 = vpop.eup %833 }
 0xeb0   :  { %551 = vrot.lane.b32.xlu0 %v834_v10, %s857_s25 }
 0xeb1   :  { %v836_v13 = vpop.eup %835 }
 0xeb2   :  { %v532_v14 = vadd.f32 1.0, %v836_v13 }
 0xeb4   :  { %837 = vrcp.f32 %v532_v14  ;;  %v544_v22 = vand.u32 2147483648, %v532_v14  ;;  %vm538_vm13 = vweird.f32 %v532_v14  ;;  %v542_v23 = vand.u32 2147483647, %v532_v14 }
 0xeb6   :  { %v545_v25 = vor.u32 1.1754944e-38, %v544_v22  ;;  %vm543_vm15 = vcmp.eq.f32.partialorder %v542_v23, 8.507059e+37 }
 0xeba   :  { %v838_v16 = vpop.eup %837 }
 0xebb   :  { %v534_v17 = vmul.f32 %v838_v16, %v532_v14  ;;  %vm539_vm12 = vweird.f32 %v838_v16 }
 0xebc   :  { %vm540_vm14 = vmor %vm538_vm13, %vm539_vm12 }
 0xebd   :  { %v535_v18 = vsub.f32 1.0, %v534_v17 }
 0xebf   :  { %v536_v20 = vmul.f32 %v838_v16, %v535_v18 }
 0xec1   :  { %v537_v21 = vadd.f32 %v838_v16, %v536_v20 }
 0xec3   :  { %v541_v24 = vsel %vm540_vm14, %v838_v16, %v537_v21 }
 0xec4   :  { %v546_v26 = vsel %vm543_vm15, %v545_v25, %v541_v24 }
 0xec5   :  { %v549_v28 = vmul.f32 %v546_v26, %v496_v0  ;;  %v669_v0 = vmul.f32 %v665_v63, %v665_v63 }
 0xec7   :  { %v676_v49 = vsel %vm672_vm7, %v669_v0, 0.0 }
 0xf22   :  { %v552_v19 = vpop.permute.xlu0 %551 }
 0xf23   :  { %v554_v27 = vmul.f32 %v552_v19, %v546_v26 }
 0xf25   :  { %556 = vrot.lane.b32.xlu1 %v554_v27, %s858_s26 }
 0xf97   :  { %v557_v29 = vpop.permute.xlu1 %556 }
 0xf98   :  { %v559_v30 = vadd.f32 %v557_v29, %v549_v28 }
 0xf9a   :  { %839 = vtanh.f32 %v559_v30 }
 0xfa0   :  { %v840_v31 = vpop.eup %839 }
 0xfa1   :  { %562 = vrot.lane.b32.xlu2 %v840_v31, %s857_s25 }
 0xffb   :  { %v563_v32 = vpop.permute.xlu2 %562 }
 0xffc   :  { %v565_v33 = vmul.f32 %v563_v32, %v546_v26 }
 0xffe   :  { %567 = vrot.lane.b32.xlu0 %v565_v33, %s858_s26 }
0x1070   :  { %v568_v34 = vpop.permute.xlu0 %567 }
0x1071   :  { %774 = vmatmul.msk.f32.vlgmr.msra.gmra.mxu3 %vm81_vm1, %v568_v34  ;;  %778 = vmatmul.msk.f32.gmra.mxu0 %vm81_vm1, %v568_v34 }
0x10ee   :  { %v658_v35 = vpop.f32.mrf.mxu0 }
0x10ef   :  { %v659_v36 = vadd.f32 %v658_v35, %v1028_v47 }
0x10f1   :  { %745 = vst.msk [vmem:[%s1100_s2 + $0x10] sm:$0xff] %vm672_vm7, %v659_v36  ;;  %v666_v4 = vsub.f32 %v659_v36, %v31_v3 }
0x10f3   :  { %v670_v5 = vmul.f32 %v666_v4, %v666_v4 }
0x10f4   :  { %v588_v37 = vpop.f32.mrf.mxu3 }
0x10f5   :  { %v591_v38 = vadd.f32 %v588_v37, %v1006_v12  ;;  %v679_v8 = vsel %vm672_vm7, %v670_v5, 0.0 }
0x10f7   :  { %841 = vtanh.f32 %v591_v38  ;;  %v775_v44 = vmul.f32 -1.442695, %v591_v38 }
0x10f9   :  { %843 = vpow2.f32 %v775_v44 }
0x10fd   :  { %v842_v39 = vpop.eup %841 }
0x10fe   :  { %614 = vrot.lane.b32.xlu1 %v842_v39, %s857_s25 }
0x10ff   :  { %v844_v45 = vpop.eup %843 }
0x1100   :  { %v595_v46 = vadd.f32 1.0, %v844_v45 }
0x1102   :  { %845 = vrcp.f32 %v595_v46  ;;  %v607_v53 = vand.u32 2147483648, %v595_v46  ;;  %vm601_vm2 = vweird.f32 %v595_v46  ;;  %v605_v54 = vand.u32 2147483647, %v595_v46 }
0x1104   :  { %v608_v55 = vor.u32 1.1754944e-38, %v607_v53  ;;  %vm606_vm4 = vcmp.eq.f32.partialorder %v605_v54, 8.507059e+37 }
0x1108   :  { %v846_v48 = vpop.eup %845 }
0x1109   :  { %v597_v50 = vmul.f32 %v846_v48, %v595_v46  ;;  %vm602_vm0 = vweird.f32 %v846_v48 }
0x110a   :  { %vm603_vm3 = vmor %vm601_vm2, %vm602_vm0 }
0x110b   :  { %v598_v51 = vsub.f32 1.0, %v597_v50 }
0x110d   :  { %v599_v52 = vmul.f32 %v846_v48, %v598_v51 }
0x110f   :  { %v600_v7 = vadd.f32 %v846_v48, %v599_v52 }
0x1111   :  { %v604_v12 = vsel %vm603_vm3, %v846_v48, %v600_v7 }
0x1112   :  { %v609_v57 = vsel %vm606_vm4, %v608_v55, %v604_v12 }
0x1113   :  { %v612_v60 = vmul.f32 %v609_v57, %v559_v30 }
0x1170   :  { %v615_v56 = vpop.permute.xlu1 %614 }
0x1171   :  { %v617_v58 = vmul.f32 %v615_v56, %v609_v57 }
0x1173   :  { %619 = vrot.lane.b32.xlu2 %v617_v58, %s858_s26 }
0x119c   :  { %674 = vadd.xlane.f32.xlu2 %v673_v42 }
0x11cd   :  { %v620_v43 = vpop.permute.xlu2 %619 }
0x11ce   :  { %v622_v15 = vadd.f32 %v620_v43, %v612_v60 }
0x11d0   :  { %847 = vtanh.f32 %v622_v15 }
0x11d6   :  { %v848_v61 = vpop.eup %847 }
0x11d7   :  { %625 = vrot.lane.b32.xlu0 %v848_v61, %s857_s25 }
0x1201   :  { %677 = vadd.xlane.f32.xlu0 %v676_v49 }
0x120f   :  { %v675_v18 = vpop.xlane.xlu2 %674 }
0x1210   :  { %vm692_vm5 = vcmp.eq.f32.partialorder %v675_v18, inf  ;;  %v695_v12 = vand.u32 2147483648, %v675_v18  ;;  %vm694_vm9 = vcmp.eq.f32.partialorder %v675_v18, 0.0 }
0x1249   :  { %v626_v1 = vpop.permute.xlu0 %625 }
0x124a   :  { %v628_v2 = vmul.f32 %v626_v1, %v609_v57 }
0x124c   :  { %631 = vrot.lane.b32.xlu1 %v628_v2, %s858_s26 }
0x1274   :  { %v678_v17 = vpop.xlane.xlu0 %677 }
0x1275   :  { %849 = vrsqrt.f32 %v678_v17  ;;  %v707_v52 = vand.u32 2147483648, %v678_v17  ;;  %vm706_vm8 = vcmp.eq.f32.partialorder %v678_v17, 0.0 }
0x1276   :  { %680 = vadd.xlane.f32.xlu1 %v679_v8  ;;  %851 = vrsqrt.f32 %v675_v18 }
0x127b   :  { %v850_v21 = vpop.eup %849 }
0x127c   :  { %v852_v22 = vpop.eup %851 }
0x127d   :  { %v686_v24 = vmul.f32 %v852_v22, %v675_v18 }
0x127f   :  { %v687_v26 = vmul.f32 %v852_v22, %v686_v24 }
0x1281   :  { %v688_v29 = vmul.f32 0.5, %v687_v26 }
0x1283   :  { %v689_v33 = vsub.f32 1.5, %v688_v29 }
0x1285   :  { %v690_v36 = vmul.f32 %v852_v22, %v689_v33 }
0x1287   :  { %v691_v45 = vmul.f32 %v690_v36, %v675_v18 }
0x1289   :  { %v693_v7 = vsel %vm692_vm5, %v675_v18, %v691_v45 }
0x128a   :  { %v696_v58 = vsel %vm694_vm9, %v695_v12, %v693_v7 }
0x12be   :  { %v632_v9 = vpop.permute.xlu1 %631 }
0x12bf   :  { %779 = vmatmul.msk.f32.gmra.mxu0 %vm81_vm1, %v632_v9  ;;  %vm704_vm1 = vcmp.eq.f32.partialorder %v678_v17, inf }
0x12e9   :  { %v681_v20 = vpop.xlane.xlu1 %680 }
0x12ea   :  { %853 = vrsqrt.f32 %v681_v20  ;;  %vm716_vm6 = vcmp.eq.f32.partialorder %v681_v20, inf  ;;  %v719_v56 = vand.u32 2147483648, %v681_v20  ;;  %vm718_vm10 = vcmp.eq.f32.partialorder %v681_v20, 0.0 }
0x12f0   :  { %v854_v23 = vpop.eup %853 }
0x12f1   :  { %v710_v25 = vmul.f32 %v854_v23, %v681_v20 }
0x12f3   :  { %v711_v27 = vmul.f32 %v854_v23, %v710_v25 }
0x12f5   :  { %v712_v30 = vmul.f32 0.5, %v711_v27 }
0x12f7   :  { %v713_v34 = vsub.f32 1.5, %v712_v30 }
0x12f9   :  { %v714_v37 = vmul.f32 %v854_v23, %v713_v34 }
0x12fb   :  { %v715_v46 = vmul.f32 %v714_v37, %v681_v20 }
0x12fd   :  { %v717_v53 = vsel %vm716_vm6, %v681_v20, %v715_v46 }
0x12fe   :  { %v720_v40 = vsel %vm718_vm10, %v719_v56, %v717_v53 }
0x133c   :  { %v661_v10 = vpop.f32.mrf.mxu0 }
0x133d   :  { %v662_v11 = vadd.f32 %v661_v10, %v1028_v47  ;;  %v698_v47 = vmul.f32 %v850_v21, %v678_v17 }
0x133f   :  { %v667_v13 = vsub.f32 %v662_v11, %v32_v6  ;;  %746 = vst.msk [vmem:[%s1100_s2 + $0x18] sm:$0xff] %vm672_vm7, %v662_v11  ;;  %v699_v19 = vmul.f32 %v850_v21, %v698_v47 }
0x1341   :  { %v671_v14 = vmul.f32 %v667_v13, %v667_v13  ;;  %v700_v28 = vmul.f32 0.5, %v699_v19 }
0x1343   :  { %v682_v16 = vsel %vm672_vm7, %v671_v14, 0.0  ;;  %v701_v31 = vsub.f32 1.5, %v700_v28 }
0x1344   :  { %683 = vadd.xlane.f32.xlu2 %v682_v16 }
0x1345   :  { %v702_v35 = vmul.f32 %v850_v21, %v701_v31 }
0x1347   :  { %v703_v39 = vmul.f32 %v702_v35, %v678_v17 }
0x1349   :  { %v705_v50 = vsel %vm704_vm1, %v678_v17, %v703_v39 }
0x134a   :  { %v708_v55 = vsel %vm706_vm8, %v707_v52, %v705_v50 }
0x134b   :  { %v733_v41 = vadd.f32 %v708_v55, %v696_v58 }
0x134d   :  { %v734_v60 = vadd.f32 %v733_v41, %v720_v40 }
0x13b7   :  { %v684_v32 = vpop.xlane.xlu2 %683 }
0x13b8   :  { %855 = vrsqrt.f32 %v684_v32  ;;  %vm728_vm11 = vcmp.eq.f32.partialorder %v684_v32, inf  ;;  %v731_v42 = vand.u32 2147483648, %v684_v32  ;;  %vm730_vm12 = vcmp.eq.f32.partialorder %v684_v32, 0.0 }
0x13be   :  { %v856_v38 = vpop.eup %855 }
0x13bf   :  { %v722_v44 = vmul.f32 %v856_v38, %v684_v32 }
0x13c1   :  { %v723_v48 = vmul.f32 %v856_v38, %v722_v44 }
0x13c3   :  { %v724_v51 = vmul.f32 0.5, %v723_v48 }
0x13c5   :  { %v725_v54 = vsub.f32 1.5, %v724_v51 }
0x13c7   :  { %v726_v57 = vmul.f32 %v856_v38, %v725_v54 }
0x13c9   :  { %v727_v59 = vmul.f32 %v726_v57, %v684_v32 }
0x13cb   :  { %v729_v43 = vsel %vm728_vm11, %v684_v32, %v727_v59 }
0x13cc   :  { %v732_v15 = vsel %vm730_vm12, %v731_v42, %v729_v43 }
0x13cd   :  { %v735_v61 = vadd.f32 %v734_v60, %v732_v15 }
0x13cf   :  { %v736_v62 = vrot.slane %v735_v61, 4 }
0x13d1   :  { %v737_v63 = vadd.f32 %v736_v62, %v735_v61 }
0x13d3   :  { %v738_v0 = vrot.slane %v737_v63, 2 }
0x13d5   :  { %v739_v49 = vadd.f32 %v738_v0, %v737_v63 }
0x13d7   :  { %v740_v1 = vrot.slane %v739_v49, 1 }
0x13d9   :  { %v741_v2 = vadd.f32 %v740_v1, %v739_v49 }
0x13db   :  { %v742_v3 = vmul.f32 0.125, %v741_v2 }
0x13dd   :  { %747 = vst.msk [vmem:[%s1100_s2 + $0x20] sm:$0xff] %vm672_vm7, %v742_v3 }

</bundles_post_ra>
